<compile_context>
chip_gen: v7x
topology: tpu7x:2x2x1
jax: 0.10.0
libtpu: 0.0.40
codegen_flags: <defaults>
</compile_context>

<pallas_src>
import jax
import jax.numpy as jnp
from jax.experimental import pallas as pl
from jax.experimental.pallas import tpu as pltpu


def _round_up(n, m):
    return ((n + m - 1) // m) * m


def _mlp_kernel(x_ref, w1_ref, b1_ref, w2_ref, b2_ref, o_ref):
    # fc1: cast the f32 x tile to bf16 in-kernel (VPU), bf16 MXU matmul with
    # f32 accumulation (matches PyTorch y = x @ W.T + b with W stored as W.T).
    x_bf = x_ref[...].astype(jnp.bfloat16)
    h = jnp.dot(x_bf, w1_ref[...], preferred_element_type=jnp.float32)
    # Bias + ReLU in f32 (VPU).
    h = jnp.maximum(h + b1_ref[...], 0.0)
    # fc2: bf16 x bf16 -> f32 on the MXU; bias add in f32.
    out = jnp.dot(h.astype(jnp.bfloat16), w2_ref[...],
                  preferred_element_type=jnp.float32)
    o_ref[...] = (out + b2_ref[...]).astype(o_ref.dtype)


def embedding_classifier_forward(x, w1, b1, w2, b2, *, tm=4096):
    """x: (B, D_in) f32; w1: (D_in, H); b1: (H,); w2: (H, C); b2: (C,).

    Returns f32 logits of shape (B, C).
    """
    B, D_in = x.shape
    H = w1.shape[1]
    C = w2.shape[1]

    # Weights cast once in the wrapper (tiny, resident in VMEM):
    # w1/w2 feed the MXU as bf16; biases stay f32 (added post-accumulation).
    w1_bf = w1.astype(jnp.bfloat16)
    w2_bf = w2.astype(jnp.bfloat16)
    b1_2d = b1.reshape(1, H).astype(jnp.float32)
    b2_2d = b2.reshape(1, C).astype(jnp.float32)

    # Batch tile: multiple of 8 sublanes (f32 x tile), capped at `tm`.
    TM = min(tm, _round_up(B, 8))
    # Ensure >= 2 grid steps when B is big enough so both v7x TCs get work.
    if B > 1024 and pl.cdiv(B, TM) < 2:
        TM = _round_up(pl.cdiv(B, 2), 8)
    grid = (pl.cdiv(B, TM),)

    flops = 2 * B * D_in * H + 2 * B * H * C
    bytes_accessed = (
        B * D_in * 4          # x read as f32 (cast to bf16 in-kernel)
        + D_in * H * 2        # w1 (bf16)
        + H * 4               # b1 (f32)
        + H * C * 2           # w2 (bf16)
        + C * 4               # b2 (f32)
        + B * C * 4           # output (f32)
    )

    return pl.pallas_call(
        _mlp_kernel,
        out_shape=jax.ShapeDtypeStruct((B, C), jnp.float32),
        grid=grid,
        in_specs=[
            # x tile advances with the batch grid index -> double-buffered DMA.
            pl.BlockSpec((TM, D_in), lambda i: (i, 0)),
            # Weights / biases: constant index_map -> resident; single buffer.
            pl.BlockSpec((D_in, H), lambda i: (0, 0),
                         pipeline_mode=pl.Buffered(1)),
            pl.BlockSpec((1, H), lambda i: (0, 0),
                         pipeline_mode=pl.Buffered(1)),
            pl.BlockSpec((H, C), lambda i: (0, 0),
                         pipeline_mode=pl.Buffered(1)),
            pl.BlockSpec((1, C), lambda i: (0, 0),
                         pipeline_mode=pl.Buffered(1)),
        ],
        out_specs=pl.BlockSpec((TM, C), lambda i: (i, 0)),
        compiler_params=pltpu.CompilerParams(
            # Batch tiles are independent -> shard across TCs on v7x megacore.
            dimension_semantics=("parallel",),
            # 32 MiB: matches v6e/v7x default scoped VMEM, raises v5e's 16 MiB
            # default so TM=4096 fits everywhere (well under physical VMEM).
            vmem_limit_bytes=32 * 1024 * 1024,
        ),
        cost_estimate=pl.CostEstimate(
            flops=flops, transcendentals=0, bytes_accessed=bytes_accessed
        ),
    )(x, w1_bf, b1_2d, w2_bf, b2_2d)


def init_params(key, input_size=384, hidden_size=128, num_classes=5):
    """Deterministic synthetic init mirroring nn.Linear's U(-1/sqrt(fan_in), ...)."""
    k1, k2, k3, k4 = jax.random.split(key, 4)
    bound1 = 1.0 / jnp.sqrt(input_size)
    bound2 = 1.0 / jnp.sqrt(hidden_size)
    # Stored as (in_features, out_features) == PyTorch weight.T
    w1 = jax.random.uniform(k1, (input_size, hidden_size), jnp.float32, -bound1, bound1)
    b1 = jax.random.uniform(k2, (hidden_size,), jnp.float32, -bound1, bound1)
    w2 = jax.random.uniform(k3, (hidden_size, num_classes), jnp.float32, -bound2, bound2)
    b2 = jax.random.uniform(k4, (num_classes,), jnp.float32, -bound2, bound2)
    return w1, b1, w2, b2


def _reference(x, w1, b1, w2, b2):
    # Pure-JAX reference applying the same bf16 casts to the matmul operands
    # as the kernel (bf16 MXU inputs, f32 accumulation, f32 bias/ReLU).
    x_bf = x.astype(jnp.bfloat16).astype(jnp.float32)
    w1_bf = w1.astype(jnp.bfloat16).astype(jnp.float32)
    h = jnp.maximum(x_bf @ w1_bf + b1, 0.0)
    h_bf = h.astype(jnp.bfloat16).astype(jnp.float32)
    w2_bf = w2.astype(jnp.bfloat16).astype(jnp.float32)
    return h_bf @ w2_bf + b2


if __name__ == "__main__":
    key = jax.random.PRNGKey(0)
    k_x, k_x2, k_p = jax.random.split(key, 3)

    input_size, hidden_size, num_classes = 384, 128, 5
    w1, b1, w2, b2 = init_params(k_p, input_size, hidden_size, num_classes)

    # Small case (B=2): single ragged block (B < TM).
    batch = 2
    x = jax.random.normal(k_x, (batch, input_size), jnp.float32)
    out = jax.block_until_ready(embedding_classifier_forward(x, w1, b1, w2, b2))
    ref = _reference(x, w1, b1, w2, b2)
    assert out.shape == (batch, num_classes)
    assert jnp.allclose(out, ref, atol=2e-2, rtol=2e-2)

    # Ragged multi-step grid (B % TM != 0): verifies edge-block masking on the
    # last batch tile and the resident-weight / multi-step pipeline path.
    batch2 = 300
    x2 = jax.random.normal(k_x2, (batch2, input_size), jnp.float32)
    out2 = jax.block_until_ready(
        embedding_classifier_forward(x2, w1, b1, w2, b2, tm=128)
    )
    ref2 = _reference(x2, w1, b1, w2, b2)
    assert out2.shape == (batch2, num_classes)
    assert jnp.allclose(out2, ref2, atol=2e-2, rtol=2e-2)

    print("KERNEL_OK")
</pallas_src>

<mosaic_0001>
module attributes {stable_mosaic.version = 11 : i64} {
  func.func @_mlp_kernel(%arg0: i32, %arg1: memref<8x384xf32, #tpu.memory_space<vmem>>, %arg2: memref<384x128xbf16, #tpu.memory_space<vmem>>, %arg3: memref<1x128xf32, #tpu.memory_space<vmem>>, %arg4: memref<128x5xbf16, #tpu.memory_space<vmem>>, %arg5: memref<1x5xf32, #tpu.memory_space<vmem>>, %arg6: memref<8x5xf32, #tpu.memory_space<vmem>>) attributes {dimension_semantics = [#tpu.dimension_semantics<parallel>], iteration_bounds = array<i64: 1>, scalar_prefetch = 0 : i64, scratch_operands = 0 : i64, tpu.core_type = #tpu.core_type<tc>, window_params = [{transform_indices = @transform_0, window_bounds = array<i64: 8, 384>}, {pipeline_mode = #tpu.pipeline_mode<synchronous>, transform_indices = @transform_1, window_bounds = array<i64: 384, 128>}, {pipeline_mode = #tpu.pipeline_mode<synchronous>, transform_indices = @transform_2, window_bounds = array<i64: 1, 128>}, {pipeline_mode = #tpu.pipeline_mode<synchronous>, transform_indices = @transform_3, window_bounds = array<i64: 128, 5>}, {pipeline_mode = #tpu.pipeline_mode<synchronous>, transform_indices = @transform_4, window_bounds = array<i64: 1, 5>}, {transform_indices = @transform_5, window_bounds = array<i64: 8, 5>}]} {
    %c0 = arith.constant 0 : index
    %c0_0 = arith.constant 0 : index
    %0 = vector.load %arg1[%c0, %c0_0] : memref<8x384xf32, #tpu.memory_space<vmem>>, vector<8x384xf32>
    %1 = arith.truncf %0 : vector<8x384xf32> to vector<8x384xbf16>
    %c0_1 = arith.constant 0 : index
    %c0_2 = arith.constant 0 : index
    %2 = vector.load %arg2[%c0_1, %c0_2] : memref<384x128xbf16, #tpu.memory_space<vmem>>, vector<384x128xbf16>
    %cst = arith.constant dense<0.000000e+00> : vector<8x128xf32>
    %3 = tpu.matmul %1, %2, %cst {dimension_numbers = #tpu.dot_dimension_numbers<[1], [0], [0], [1], [0, 0, 1, 1], [], []>} : vector<8x384xbf16>, vector<384x128xbf16>, vector<8x128xf32> -> vector<8x128xf32>
    %c0_3 = arith.constant 0 : index
    %c0_4 = arith.constant 0 : index
    %4 = vector.load %arg3[%c0_3, %c0_4] : memref<1x128xf32, #tpu.memory_space<vmem>>, vector<1x128xf32>
    %5 = vector.broadcast %4 : vector<1x128xf32> to vector<8x128xf32>
    %6 = arith.addf %3, %5 : vector<8x128xf32>
    %cst_5 = arith.constant 0.000000e+00 : f32
    %7 = vector.broadcast %cst_5 : f32 to vector<8x128xf32>
    %8 = arith.maximumf %6, %7 : vector<8x128xf32>
    %9 = arith.truncf %8 : vector<8x128xf32> to vector<8x128xbf16>
    %c0_6 = arith.constant 0 : index
    %c0_7 = arith.constant 0 : index
    %10 = vector.load %arg4[%c0_6, %c0_7] : memref<128x5xbf16, #tpu.memory_space<vmem>>, vector<128x5xbf16>
    %cst_8 = arith.constant dense<0.000000e+00> : vector<8x5xf32>
    %11 = tpu.matmul %9, %10, %cst_8 {dimension_numbers = #tpu.dot_dimension_numbers<[1], [0], [0], [1], [0, 0, 1, 1], [], []>} : vector<8x128xbf16>, vector<128x5xbf16>, vector<8x5xf32> -> vector<8x5xf32>
    %c0_9 = arith.constant 0 : index
    %c0_10 = arith.constant 0 : index
    %12 = vector.load %arg5[%c0_9, %c0_10] : memref<1x5xf32, #tpu.memory_space<vmem>>, vector<1x5xf32>
    %13 = vector.broadcast %12 : vector<1x5xf32> to vector<8x5xf32>
    %14 = arith.addf %11, %13 : vector<8x5xf32>
    %c0_11 = arith.constant 0 : index
    %c0_12 = arith.constant 0 : index
    %15 = vector.load %arg6[%c0_11, %c0_12] : memref<8x5xf32, #tpu.memory_space<vmem>>, vector<8x5xf32>
    tpu.vector_store %arg6[%c0_11, %c0_12], %14 {strides = array<i32>} : memref<8x5xf32, #tpu.memory_space<vmem>>, vector<8x5xf32>,
    return
  }
  func.func @transform_0(%arg0: i32) -> (i32, i32) {
    %c0_i32 = arith.constant 0 : i32
    %c0_i32_0 = arith.constant 0 : i32
    return %arg0, %c0_i32 : i32, i32
  }
  func.func @transform_1(%arg0: i32) -> (i32, i32) {
    %c0_i32 = arith.constant 0 : i32
    %c0_i32_0 = arith.constant 0 : i32
    %c0_i32_1 = arith.constant 0 : i32
    return %c0_i32, %c0_i32_0 : i32, i32
  }
  func.func @transform_2(%arg0: i32) -> (i32, i32) {
    %c0_i32 = arith.constant 0 : i32
    %c0_i32_0 = arith.constant 0 : i32
    %c0_i32_1 = arith.constant 0 : i32
    return %c0_i32, %c0_i32_0 : i32, i32
  }
  func.func @transform_3(%arg0: i32) -> (i32, i32) {
    %c0_i32 = arith.constant 0 : i32
    %c0_i32_0 = arith.constant 0 : i32
    %c0_i32_1 = arith.constant 0 : i32
    return %c0_i32, %c0_i32_0 : i32, i32
  }
  func.func @transform_4(%arg0: i32) -> (i32, i32) {
    %c0_i32 = arith.constant 0 : i32
    %c0_i32_0 = arith.constant 0 : i32
    %c0_i32_1 = arith.constant 0 : i32
    return %c0_i32, %c0_i32_0 : i32, i32
  }
  func.func @transform_5(%arg0: i32) -> (i32, i32) {
    %c0_i32 = arith.constant 0 : i32
    %c0_i32_0 = arith.constant 0 : i32
    return %arg0, %c0_i32 : i32, i32
  }
}

</mosaic_0001>

<bundles_post_ra>
// kernel: tpu_custom_call.1
= control target key start
LH: loop header
LB: loop body
LE: loop exit
PB: predicated region body
PF: predicated region fallthrough
CT: control target
= control target key end

     0   :  { %10 = vsyncpa [#allocation3], 0  ;;  %s830_s0 = inlined_call_operand.vmem [shape: f32[2,384], index: 0, kind: input, shape index: {}]   ;;  %s831_s1 = inlined_call_operand.hbm [shape: bf16[384,128], index: 1, kind: input, shape index: {}]   ;;  %s832_s2 = inlined_call_operand.vmem [shape: f32[1,128], index: 2, kind: input, shape index: {}]   ;;  %s833_s3 = inlined_call_operand.vmem [shape: bf16[128,5], index: 3, kind: input, shape index: {}]   ;;  %s834_s4 = inlined_call_operand.vmem [shape: f32[1,5], index: 4, kind: input, shape index: {}]   ;;  %s835_s5 = inlined_call_operand.hbm [shape: f32[2,5], index: 5, kind: output, shape index: {}]  }
   0x1   :  { %11 = vsyncpa [#allocation4], 0  ;;  %s705_s18 = smov [#allocation2]   ;;  %s657_s22 = scalar_lea.hbm %s831_s1, 3072 }
   0x2   :  { %s19_s19 = sshll.u32 %s705_s18, 4  ;;  %p658_p0 = scmp.ne.s32.totalorder %s831_s1, %s657_s22  ;;  %s20_s19 = int_to_ptr.vmem [resolvable:$true] %s19_s19 }
   0x3   :  { %p661_p1 = scmp.lt.u32.totalorder %s657_s22, %s831_s1 }
   0x5   :  { %p663_p2 = pnand %p661_p1, %p658_p0 }
   0x7   :  { %666 = shalt.err (!%p663_p2)
}
   0x8   :  { %s667_s27 = scalar_lea.vmem %s20_s19, 3072  ;;  %p672_p4 = scmp.lt.s32.totalorder %s20_s19, %s20_s19 }
   0x9   :  { %p668_p3 = scmp.ne.s32.totalorder %s20_s19, %s667_s27  ;;  %p673_p5 = scmp.lt.s32.totalorder %s667_s27, %s667_s27 }
   0xb   :  { %p674_p6 = por %p673_p5, %p672_p4 }
   0xd   :  { %p675_p7 = pnand %p674_p6, %p668_p3 }
   0xf   :  { %678 = shalt.err (!%p675_p7)
}
  0x10   :  { %s706_s28 = smov 64   ;;  %s707_s29 = smov 4  }
  0x11   :  { %25 = dma.hbm_to_vmem [thread:$0]  %s831_s1, 3072, %s20_s19, [#allocation3], %s706_s28, %s706_s28, %s707_s29  }
  0x12   :  { %701 = dma.done.wait [#allocation3], 3072  }
  0x13   :  { %702 = vsyncadd [#allocation3], 4294964224  ;;  %v708_v0 = vmov 0.0   ;;  %vm709_vm0 = vmmov 0   ;;  %v619_v1 = vld [vmem:[#allocation2 + $0x40] sm:$0xff]   ;;  %v622_v4 = vld [vmem:[#allocation2 + $0x48] sm:$0xff]   ;;  %v51_v17 = vlaneseq }
  0x14   :  { %570 = vmatprep.subr.bf16.mxu1 %v708_v0  ;;  %586 = vmatprep.mubr.msk.bf16.mxu1 %vm709_vm0, %v708_v0  ;;  %v620_v2 = vld [vmem:[#allocation2] sm:$0xff]   ;;  %v623_v5 = vld [vmem:[#allocation2 + $0x8] sm:$0xff]   ;;  %v625_v7 = vld [vmem:[#allocation2 + $0x50] sm:$0xff]   ;;  %v710_v15 = vmov 1983009808   ;;  %vm477_vm1 = vcmask 39936  }
  0x15   :  { %530 = vmatprep.subr.bf16.mxu0 %v619_v1  ;;  %v621_v3 = vld [vmem:[#allocation2 + $0x80] sm:$0xff]   ;;  %v624_v6 = vld [vmem:[#allocation2 + $0x88] sm:$0xff]   ;;  %v626_v8 = vld [vmem:[#allocation2 + $0x10] sm:$0xff]   ;;  %v49_v16 = vunpack.c.l.s4 %v710_v15  ;;  %v52_v22 = vshrl.u32 %v51_v17, 7 }
  0x16   :  { %531 = vmatpush3.bf16.msra.mxu0 %v620_v2  ;;  %571 = vmatpush3.bf16.msra.mxu1 %v621_v3  ;;  %v627_v9 = vld [vmem:[#allocation2 + $0x90] sm:$0xff]   ;;  %v628_v10 = vld [vmem:[#allocation2 + $0x58] sm:$0xff]   ;;  %v631_v13 = vld [vmem:[#allocation2 + $0x60] sm:$0xff]  }
  0x17   :  { %532 = vmatprep.subr.bf16.mxu0 %v622_v4  ;;  %572 = vmatprep.subr.bf16.mxu1 %v708_v0  ;;  %v629_v11 = vld [vmem:[#allocation2 + $0x18] sm:$0xff]   ;;  %v632_v14 = vld [vmem:[#allocation2 + $0x20] sm:$0xff]   ;;  %v634_v19 = vld [vmem:[#allocation2 + $0x68] sm:$0xff]   ;;  %v50_v21 = vunpack.c.0.s8 %v49_v16 }
  0x18   :  { %v630_v12 = vld [vmem:[#allocation2 + $0x98] sm:$0xff]   ;;  %v633_v18 = vld [vmem:[#allocation2 + $0xa0] sm:$0xff]   ;;  %v635_v20 = vld [vmem:[#allocation2 + $0x28] sm:$0xff]  }
  0x19   :  { %v636_v23 = vld [vmem:[#allocation2 + $0xa8] sm:$0xff]   ;;  %v637_v24 = vld [vmem:[#allocation2 + $0x70] sm:$0xff]   ;;  %v640_v27 = vld [vmem:[#allocation2 + $0x78] sm:$0xff]   ;;  %v53_v28 = vsub.s32 %v50_v21, %v52_v22 }
  0x1a   :  { %533 = vmatpush3.bf16.msra.mxu0 %v623_v5  ;;  %573 = vmatpush3.bf16.msra.mxu1 %v624_v6  ;;  %v638_v25 = vld [vmem:[#allocation2 + $0x30] sm:$0xff]   ;;  %v642_v29 = vld [vmem:[%s830_s0] ss:$6 sps:$4 sm:$0xff]   ;;  %v644_v31 = vld [vmem:[%s830_s0 + $0x4] ss:$6 sps:$4 sm:$0x33]  }
  0x1b   :  { %534 = vmatprep.subr.bf16.mxu0 %v625_v7  ;;  %574 = vmatprep.subr.bf16.mxu1 %v708_v0  ;;  %v639_v26 = vld [vmem:[#allocation2 + $0xb0] sm:$0xff]   ;;  %v54_v33 = vrot.slane %v642_v29, %v53_v28  ;;  %v641_v35 = vld [vmem:[#allocation2 + $0x38] sm:$0xff]   ;;  %v61_v36 = vrot.slane %v644_v31, %v53_v28  ;;  %v649_v45 = vld [vmem:[%s833_s3] sm:$0xff]  }
  0x1c   :  { %v645_v30 = vld [vmem:[%s830_s0 + $0xc] ss:$6 sps:$4 sm:$0xff]   ;;  %v647_v32 = vld [vmem:[%s830_s0 + $0x10] ss:$6 sps:$4 sm:$0x33]   ;;  %v648_v39 = vld [vmem:[#allocation2 + $0xb8] sm:$0xff]  }
  0x1d   :  { %v68_v34 = vrot.slane %v645_v30, %v53_v28  ;;  %v75_v37 = vrot.slane %v647_v32, %v53_v28  ;;  %v650_v46 = vld [vmem:[%s833_s3 + $0x8] sm:$0xff]   ;;  %v651_v47 = vld [vmem:[%s833_s3 + $0x10] sm:$0xff]   ;;  %v652_v48 = vld [vmem:[%s833_s3 + $0x18] sm:$0xff]  }
  0x1e   :  { %535 = vmatpush3.bf16.msra.mxu0 %v626_v8  ;;  %575 = vmatpush3.bf16.msra.mxu1 %v627_v9  ;;  %v653_v49 = vld [vmem:[%s833_s3 + $0x20] sm:$0xff]   ;;  %v654_v50 = vld [vmem:[%s833_s3 + $0x28] sm:$0xff]   ;;  %v655_v51 = vld [vmem:[%s833_s3 + $0x30] sm:$0xff]  }
  0x1f   :  { %536 = vmatprep.subr.bf16.mxu0 %v628_v10  ;;  %576 = vmatprep.subr.bf16.mxu1 %v708_v0  ;;  %v77_v38 = vcombine.high %v54_v33, %v68_v34  ;;  %v76_v40 = vcombine.low %v54_v33, %v68_v34  ;;  %v78_v41 = vcombine.low %v61_v36, %v75_v37  ;;  %v656_v52 = vld [vmem:[%s833_s3 + $0x38] sm:$0xff]   ;;  %v496_v55 = vld [vmem:[%s832_s2] ss:$0 sm:$0xff] }
  0x20   :  { %v521_v3 = vld [vmem:[%s834_s4] ss:$0 sm:$0xff] }
  0x21   :  { %v83_v42 = vpack.c.bf16 %v77_v38, %v77_v38  ;;  %v82_v43 = vpack.c.bf16 %v76_v40, %v76_v40  ;;  %v84_v44 = vpack.c.bf16 %v78_v41, %v78_v41 }
  0x22   :  { %537 = vmatpush3.bf16.msra.mxu0 %v629_v11  ;;  %577 = vmatpush3.bf16.msra.mxu1 %v630_v12 }
  0x23   :  { %538 = vmatprep.subr.bf16.mxu0 %v631_v13  ;;  %578 = vmatprep.subr.bf16.mxu1 %v708_v0 }
  0x24   :  { %316 = vmatprep.mubr.bf16.mxu0 %v83_v42 }
  0x26   :  { %539 = vmatpush3.bf16.msra.mxu0 %v632_v14  ;;  %579 = vmatpush3.bf16.msra.mxu1 %v633_v18 }
  0x27   :  { %540 = vmatprep.subr.bf16.mxu0 %v634_v19  ;;  %580 = vmatprep.subr.bf16.mxu1 %v708_v0 }
  0x2a   :  { %541 = vmatpush3.bf16.msra.mxu0 %v635_v20  ;;  %581 = vmatpush3.bf16.msra.mxu1 %v636_v23 }
  0x2b   :  { %542 = vmatprep.subr.bf16.mxu0 %v637_v24  ;;  %582 = vmatprep.subr.bf16.mxu1 %v708_v0 }
  0x2e   :  { %543 = vmatpush3.bf16.msra.mxu0 %v638_v25  ;;  %583 = vmatpush3.bf16.msra.mxu1 %v639_v26 }
  0x2f   :  { %544 = vmatprep.subr.bf16.mxu0 %v640_v27  ;;  %584 = vmatprep.subr.bf16.mxu1 %v708_v0 }
  0x32   :  { %545 = vmatpush3.bf16.msra.mxu0 %v641_v35  ;;  %585 = vmatpush3.bf16.msra.mxu1 %v648_v39 }
  0x33   :  { %590 = vmatprep.subr.bf16.mxu0 %v708_v0 }
  0x35   :  { %317 = vmatmul.mubr.bf16.vlgmr.msra.gmra.mrb[0].mxu0 %v82_v43  ;;  %587 = vmatmul.mubr.bf16.vlgmr.msra.gmra.mrb[0].mxu1 %v84_v44 }
  0x36   :  { %591 = vmatpush3.bf16.msra.mxu0 %v649_v45  ;;  %606 = vmatprep.mubr.msk.bf16.mxu0 %vm709_vm0, %v708_v0 }
  0x37   :  { %592 = vmatprep.subr.bf16.mxu0 %v708_v0 }
  0x3a   :  { %593 = vmatpush3.bf16.msra.mxu0 %v650_v46 }
  0x3b   :  { %594 = vmatprep.subr.bf16.mxu0 %v708_v0 }
  0x3e   :  { %595 = vmatpush3.bf16.msra.mxu0 %v651_v47 }
  0x3f   :  { %596 = vmatprep.subr.bf16.mxu0 %v708_v0 }
  0x42   :  { %597 = vmatpush3.bf16.msra.mxu0 %v652_v48 }
  0x43   :  { %598 = vmatprep.subr.bf16.mxu0 %v708_v0 }
  0x46   :  { %599 = vmatpush3.bf16.msra.mxu0 %v653_v49 }
  0x47   :  { %600 = vmatprep.subr.bf16.mxu0 %v708_v0 }
  0x4a   :  { %601 = vmatpush3.bf16.msra.mxu0 %v654_v50 }
  0x4b   :  { %602 = vmatprep.subr.bf16.mxu0 %v708_v0 }
  0x4e   :  { %603 = vmatpush3.bf16.msra.mxu0 %v655_v51 }
  0x4f   :  { %604 = vmatprep.subr.bf16.mxu0 %v708_v0 }
  0x52   :  { %605 = vmatpush3.bf16.msra.mxu0 %v656_v52 }
 0x108   :  { %v546_v53 = vpop.f32.mrb[0].mxu0  ;;  %v358_v56 = vpop.f32.mrb[0].mxu1 }
 0x109   :  { %v547_v54 = vpop.f32.mrb[1].mxu0  ;;  %v588_v59 = vpop.f32.mrb[1].mxu1 }
 0x10a   :  { %v548_v57 = vadd.f32 %v547_v54, %v546_v53  ;;  %v549_v58 = vpop.f32.mrb[2].mxu0  ;;  %v361_v61 = vpop.f32.mrb[2].mxu1 }
 0x10b   :  { %v550_v60 = vpop.f32.mrb[3].mxu0  ;;  %v589_v63 = vpop.f32.mrb[3].mxu1 }
 0x10c   :  { %v319_v62 = vadd.f32 %v548_v57, %v496_v55 }
 0x10e   :  { %v359_v0 = vadd.f32 %v358_v56, %v319_v62 }
 0x110   :  { %v364_v1 = vmax.f32 %v359_v0, 0.0 }
 0x112   :  { %v365_v2 = vpack.c.bf16 %v364_v1, %v364_v1 }
 0x114   :  { %607 = vmatmul.mubr.bf16.vlgmr.msra.gmra.mrb[4].mxu0 %v365_v2 }
 0x1e7   :  { %v471_v4 = vpop.f32.mrb[4].mxu0 }
 0x1e8   :  { %v472_v5 = vadd.f32 %v521_v3, %v471_v4  ;;  %v608_v6 = vpop.f32.mrb[5].mxu0 }
 0x1e9   :  { %v474_v7 = vpop.f32.mrb[6].mxu0 }
 0x1ea   :  { %478 = vst.msk [vmem:[#allocation5] sm:$0xff] %vm477_vm1, %v472_v5  ;;  %v609_v8 = vpop.f32.mrb[7].mxu0 }
 0x1eb   :  { %483 = vsyncadd [#allocation4], 96  ;;  %s711_s2 = smov [#allocation5]  }
 0x1ec   :  { %s484_s1 = sshll.u32 %s711_s2, 4  ;;  %s485_s1 = int_to_ptr.vmem [resolvable:$true] %s484_s1 }
 0x1ed   :  { %s679_s7 = scalar_lea.vmem %s485_s1, 32  ;;  %s683_s8 = scalar_lea.vmem %s485_s1, 128 }
 0x1ee   :  { %p680_p8 = scmp.ne.s32.totalorder %s485_s1, %s679_s7  ;;  %p684_p9 = scmp.lt.s32.totalorder %s485_s1, %s485_s1 }
 0x1ef   :  { %p685_p10 = scmp.lt.s32.totalorder %s683_s8, %s679_s7 }
 0x1f1   :  { %p686_p11 = por %p685_p10, %p684_p9 }
 0x1f3   :  { %p687_p12 = pnand %p686_p11, %p680_p8 }
 0x1f5   :  { %690 = shalt.err (!%p687_p12)
}
 0x1f6   :  { %s691_s10 = scalar_lea.hbm %s835_s5, 32 }
 0x1f7   :  { %p692_p13 = scmp.ne.s32.totalorder %s835_s5, %s691_s10  ;;  %p695_p0 = scmp.lt.u32.totalorder %s691_s10, %s835_s5 }
 0x1f9   :  { %p697_p1 = pnand %p695_p0, %p692_p13 }
 0x1fb   :  { %700 = shalt.err (!%p697_p1)
}
 0x1fc   :  { %s712_s0 = smov 32   ;;  %s713_s15 = smov 2  }
 0x1fd   :  { %490 = dma.vmem_to_hbm [thread:$0]  %s485_s1, 32, %s835_s5, [#allocation4], %s712_s0, %s712_s0, %s713_s15  }
 0x1fe   :  { %703 = dma.done.wait [#allocation4], 128  }
 0x1ff   :  { %704 = vsyncadd [#allocation4], 4294967168 }
 0x200   :  { %494 = vsyncpa [#allocation3], 1 }
 0x201   :  { %495 = vsyncpa [#allocation4], 1 }

</bundles_post_ra>
